<compile_context>
chip_gen: v6e
topology: v6e:2x2x1
jax: 0.10.0
libtpu: 0.0.40
codegen_flags: <defaults>
</compile_context>

<pallas_src>
import jax
import jax.numpy as jnp
from jax.experimental import pallas as pl
from jax.experimental.pallas import tpu as pltpu


def _norm_kernel(ratio_ref, x_ref, o_ref):
    # ratio_ref: (BR, 1); x_ref / o_ref: (BR, BL).  Pure VPU broadcast subtract.
    o_ref[...] = x_ref[...] - ratio_ref[...]


def _choose_tiles(nc, hw, itemsize, target_block_bytes=4 << 20, max_rows=1024):
    """Fixed tiles + cdiv grid (Pallas masks the ragged tail).

    Policy:
      * Prefer bl == hw (fully contiguous block rows) whenever an 8-row stripe
        fits the per-block byte budget; otherwise the largest multiple of 128
        that fits (bulk stays lane-dense; only the tail block is masked).
      * Fill the remaining budget with rows (multiple of 8), capped, never
        exceeding nc (full extent is always a legal block dim).
      * When the grid would collapse to (1, 1) but nc >= 16, split rows so the
        "parallel" row axis can shard across v7x's two TensorCores.
    """
    # --- lane tile -------------------------------------------------------
    if hw * 8 * itemsize <= target_block_bytes:
        bl = hw
    else:
        bl = (target_block_bytes // (8 * itemsize)) // 128 * 128
        bl = int(max(128, min(bl, hw)))

    # --- row tile ----------------------------------------------------------
    br = target_block_bytes // (bl * itemsize)
    br = int(max(8, (br // 8) * 8))
    br = min(br, max_rows)
    if br >= nc:
        br = nc

    # --- megacore: prefer >= 2 row steps when rows can legally be split -----
    if pl.cdiv(nc, br) == 1 and pl.cdiv(hw, bl) == 1 and nc >= 16:
        br = int(((pl.cdiv(nc, 2) + 7) // 8) * 8)

    return br, bl


def normalization_forward(x, mean, std):
    """x: (N, C, H, W).  mean, std: broadcastable to (1, C, 1, 1) parameters."""
    N, C, H, W = x.shape
    nc, hw = N * C, H * W

    # Hoisted once in the wrapper (cannot be CSE'd across grid steps in-kernel).
    ratio_c = (jnp.asarray(mean, x.dtype) / jnp.asarray(std, x.dtype)).reshape((C,))
    # Row r of the flattened (N*C, H*W) view corresponds to channel r % C.
    ratio_rows = jnp.tile(ratio_c, N).reshape((nc, 1))

    # Wrapper-side reshape is free layout plumbing (row-major, same bytes).
    x2d = x.reshape((nc, hw))

    itemsize = jnp.dtype(x.dtype).itemsize
    br, bl = _choose_tiles(nc, hw, itemsize)
    # Rows outer, lanes inner: ratio's block index is constant across the inner
    # lane sweep, so its tiny (br, 1) tile is not re-DMA'd per lane step.
    grid = (pl.cdiv(nc, br), pl.cdiv(hw, bl))

    y2d = pl.pallas_call(
        _norm_kernel,
        grid=grid,
        in_specs=[
            pl.BlockSpec((br, 1), lambda r, l: (r, 0)),
            pl.BlockSpec((br, bl), lambda r, l: (r, l)),
        ],
        out_specs=pl.BlockSpec((br, bl), lambda r, l: (r, l)),
        out_shape=jax.ShapeDtypeStruct((nc, hw), x.dtype),
        compiler_params=pltpu.CompilerParams(
            dimension_semantics=("parallel", "parallel"),
            # ~16 MiB live (4 MiB in + 4 MiB out, double-buffered, + ratio).
            # Raise the scoped-VMEM cap past v5e's 16 MiB default; stays well
            # under v7x's 64 MiB physical VMEM.
            vmem_limit_bytes=40 * 1024 * 1024,
        ),
    )(ratio_rows, x2d)

    return y2d.reshape((N, C, H, W))


class Normalization:
    """JAX/Pallas port of the PyTorch Normalization module."""

    def __init__(self, mean=None, std=None, n_channels=3):
        self.n_channels = n_channels
        if mean is None:
            mean = [0.5] * n_channels
        if std is None:
            std = [0.5] * n_channels
        # Parameters stored as (1, C, 1, 1), like the PyTorch module.
        self.mean = jnp.asarray(list(mean), dtype=jnp.float32).reshape(
            (1, n_channels, 1, 1)
        )
        self.std = jnp.asarray(list(std), dtype=jnp.float32).reshape(
            (1, n_channels, 1, 1)
        )

    def __call__(self, x):
        return normalization_forward(x, self.mean, self.std)


if __name__ == "__main__":
    key = jax.random.PRNGKey(0)
    N, C, H, W = 2, 4, 16, 16
    x = jax.random.normal(key, (N, C, H, W), dtype=jnp.float32)

    # Deterministic parameter init (module defaults when mean/std are None).
    module = Normalization(mean=None, std=None, n_channels=C)

    y = module(x)
    y = jax.block_until_ready(y)

    # Reference in plain JAX (same operator precedence as the PyTorch forward).
    y_ref = x - module.mean / module.std
    assert y.shape == (N, C, H, W)
    assert jnp.allclose(y, y_ref, atol=1e-6), "mismatch vs reference"

    print("KERNEL_OK")
</pallas_src>

<mosaic_0001>
module attributes {stable_mosaic.version = 11 : i64} {
  func.func @_norm_kernel(%arg0: i32, %arg1: i32, %arg2: memref<8x1xf32, #tpu.memory_space<vmem>>, %arg3: memref<8x256xf32, #tpu.memory_space<vmem>>, %arg4: memref<8x256xf32, #tpu.memory_space<vmem>>) attributes {dimension_semantics = [#tpu.dimension_semantics<parallel>, #tpu.dimension_semantics<parallel>], iteration_bounds = array<i64: 1, 1>, scalar_prefetch = 0 : i64, scratch_operands = 0 : i64, tpu.core_type = #tpu.core_type<tc>, window_params = [{transform_indices = @transform_0, window_bounds = array<i64: 8, 1>}, {transform_indices = @transform_1, window_bounds = array<i64: 8, 256>}, {transform_indices = @transform_2, window_bounds = array<i64: 8, 256>}]} {
    %c0 = arith.constant 0 : index
    %c0_0 = arith.constant 0 : index
    %0 = vector.load %arg3[%c0, %c0_0] : memref<8x256xf32, #tpu.memory_space<vmem>>, vector<8x256xf32>
    %c0_1 = arith.constant 0 : index
    %c0_2 = arith.constant 0 : index
    %1 = vector.load %arg2[%c0_1, %c0_2] : memref<8x1xf32, #tpu.memory_space<vmem>>, vector<8x1xf32>
    %2 = vector.broadcast %1 : vector<8x1xf32> to vector<8x256xf32>
    %3 = arith.subf %0, %2 : vector<8x256xf32>
    %c0_3 = arith.constant 0 : index
    %c0_4 = arith.constant 0 : index
    %4 = vector.load %arg4[%c0_3, %c0_4] : memref<8x256xf32, #tpu.memory_space<vmem>>, vector<8x256xf32>
    tpu.vector_store %arg4[%c0_3, %c0_4], %3 {strides = array<i32>} : memref<8x256xf32, #tpu.memory_space<vmem>>, vector<8x256xf32>,
    return
  }
  func.func @transform_0(%arg0: i32, %arg1: i32) -> (i32, i32) {
    %c0_i32 = arith.constant 0 : i32
    %c0_i32_0 = arith.constant 0 : i32
    return %arg0, %c0_i32 : i32, i32
  }
  func.func @transform_1(%arg0: i32, %arg1: i32) -> (i32, i32) {
    %c0_i32 = arith.constant 0 : i32
    return %arg0, %arg1 : i32, i32
  }
  func.func @transform_2(%arg0: i32, %arg1: i32) -> (i32, i32) {
    %c0_i32 = arith.constant 0 : i32
    return %arg0, %arg1 : i32, i32
  }
}

</mosaic_0001>

<bundles_post_ra>
// kernel: tpu_custom_call.1
= control target key start
LH: loop header
LB: loop body
LE: loop exit
PB: predicated region body
PF: predicated region fallthrough
CT: control target
= control target key end

     0   :  { %7 = vsyncpa [#allocation3], 0  ;;  %s126_s0 = inlined_call_operand.vmem [shape: f32[8,1], index: 0, kind: input, shape index: {}]   ;;  %s127_s1 = inlined_call_operand.hbm [shape: f32[8,256], index: 1, kind: input, shape index: {}]   ;;  %s128_s2 = inlined_call_operand.hbm [shape: f32[8,256], index: 2, kind: output, shape index: {}]  }
   0x1   :  { %8 = vsyncpa [#allocation4], 0  ;;  %s99_s9 = smov [#allocation2]  }
   0x2   :  { %s17_s10 = sshll.u32 %s99_s9, 4  ;;  %s18_s10 = int_to_ptr.vmem [resolvable:$true] %s17_s10 }
   0x3   :  { %s63_s11 = scalar_lea.vmem %s18_s10, 256  ;;  %p68_p1 = scmp.lt.s32.totalorder %s18_s10, %s18_s10 }
   0x4   :  { %p64_p0 = scmp.ne.s32.totalorder %s18_s10, %s63_s11  ;;  %p69_p2 = scmp.lt.s32.totalorder %s63_s11, %s63_s11 }
   0x6   :  { %p70_p3 = por %p69_p2, %p68_p1 }
   0x8   :  { %p71_p4 = pnand %p70_p3, %p64_p0 }
   0xa   :  { %74 = shalt.err (!%p71_p4)
}
   0xb   :  { %20 = dma.hbm_to_vmem [thread:$0]  %s127_s1, 256, %s18_s10, [#allocation3]  }
   0xc   :  { %95 = dma.done.wait [#allocation3], 256  }
   0xd   :  { %96 = vsyncadd [#allocation3], 4294967040  ;;  %v100_v0 = vmov 0   ;;  %v26_v1 = vld [vmem:[%s126_s0] sm:$0xff]  ;;  %v25_v3 = vld [vmem:[#allocation2 + $0x8] sm:$0xff]  ;;  %s101_s16 = smov [#allocation5]  }
   0xe   :  { %54 = vset.pattern.permute.xlu0 %v100_v0  ;;  %v24_v2 = vld [vmem:[#allocation2] sm:$0xff]  ;;  %s42_s17 = sshll.u32 %s101_s16, 4  ;;  %s43_s17 = int_to_ptr.vmem [resolvable:$true] %s42_s17 }
   0xf   :  { %29 = vperm.xlu0 %54, %v26_v1   ;;  %s75_s1 = scalar_lea.vmem %s43_s17, 256  ;;  %p80_p6 = scmp.lt.s32.totalorder %s43_s17, %s43_s17 }
  0x10   :  { %p76_p5 = scmp.ne.s32.totalorder %s43_s17, %s75_s1  ;;  %p81_p7 = scmp.lt.s32.totalorder %s75_s1, %s75_s1 }
  0x12   :  { %p82_p8 = por %p81_p7, %p80_p6 }
  0x14   :  { %p83_p9 = pnand %p82_p8, %p76_p5 }
  0x8a   :  { %v30_v4 = vpop.permute.xlu0 %29 }
  0x8b   :  { %v32_v5 = vsub.f32 %v24_v2, %v30_v4  ;;  %v33_v6 = vsub.f32 %v25_v3, %v30_v4 }
  0x8d   :  { %34 = vst [vmem:[#allocation5] sm:$0xff] %v32_v5  ;;  %35 = vst [vmem:[#allocation5 + $0x8] sm:$0xff] %v33_v6 }
  0x8e   :  { %86 = shalt.err (!%p83_p9)
}
  0x8f   :  { %45 = dma.vmem_to_hbm [thread:$0]  %s43_s17, 256, %s128_s2, [#allocation4]  }
  0x90   :  { %97 = dma.done.wait [#allocation4], 256  }
  0x91   :  { %98 = vsyncadd [#allocation4], 4294967040 }
  0x92   :  { %49 = vsyncpa [#allocation3], 1 }
  0x93   :  { %50 = vsyncpa [#allocation4], 1 }

</bundles_post_ra>
